<compile_context>
chip_gen: v7x
topology: tpu7x:2x2x1
jax: 0.10.0
libtpu: 0.0.40
codegen_flags: <defaults>
</compile_context>

<pallas_src>
import functools

import jax
import jax.numpy as jnp
from jax.experimental import pallas as pl
from jax.experimental.pallas import tpu as pltpu


def conv3x3_in_lrelu_kernel(x_ref, w_ref, g_ref, b_ref, o_ref, *, eps, slope):
    # x_ref: (B, K, H*W)   channel-major im2col patches (K order = OIHW flatten)
    # w_ref: (Cout, K)     flattened conv weight (OIHW -> (Cout, Cin*3*3))
    # g_ref: (Cout, 1)     InstanceNorm gamma (per-sublane scalar)
    # b_ref: (Cout, 1)     InstanceNorm beta
    # o_ref: (B, Cout, H*W) channel-major output block (NCHW row-major flatten)
    B = x_ref.shape[0]

    w = w_ref[...]
    gamma = g_ref[...].astype(jnp.float32)   # (Cout, 1)
    beta = b_ref[...].astype(jnp.float32)    # (Cout, 1)

    # B is a compile-time block size (1 or 2 here): static unroll is fine.
    for b in range(B):
        # Conv as a single fused im2col GEMM on the MXU: (Cout,K) @ (K,HW) -> (Cout,HW)
        y = jnp.dot(w, x_ref[b], preferred_element_type=jnp.float32)

        # InstanceNorm2d: per-channel mean / biased variance over spatial
        # positions -> cheap lane reductions (channels live on sublanes).
        mean = jnp.mean(y, axis=1, keepdims=True)              # (Cout, 1)
        centered = y - mean
        var = jnp.mean(centered * centered, axis=1, keepdims=True)

        # Fold gamma into the normalization scale (saves one VPU pass);
        # rsqrt runs on the EUP.
        scale = gamma * jax.lax.rsqrt(var + eps)                # (Cout, 1)
        y = centered * scale + beta

        # LeakyReLU(slope)
        y = jnp.where(y >= 0, y, slope * y)

        # Dense, unmasked store; no relayout needed (already NCHW-flat layout).
        o_ref[b] = y.astype(o_ref.dtype)


def same_block_forward(x_nchw, weight_oihw, gamma, beta, *,
                       eps=1e-5, slope=0.01, images_per_block=None):
    """Forward pass matching SameBlock(in_channels, out_channels, r=slope)(x), NCHW input."""
    N, Cin, H, W = x_nchw.shape
    Cout = weight_oihw.shape[0]
    K = 9 * Cin
    HW = H * W

    if images_per_block is None:
        # >=2 parallel steps when N is even (keeps both v7x TensorCores busy)
        # while halving step-count/overhead vs. per-image steps on v5e/v6e.
        images_per_block = N // 2 if (N >= 2 and N % 2 == 0) else 1
    assert N % images_per_block == 0
    n_steps = N // images_per_block

    # ---- wrapper-side layout glue (XLA), channel-major, NO transposes --------
    # Zero-pad H/W by 1, build the 9 taps, stack them *after* the channel axis so
    # the K index order (cin, kh, kw) matches the plain OIHW weight flatten.
    x_pad = jnp.pad(x_nchw, ((0, 0), (0, 0), (1, 1), (1, 1)))
    taps = [x_pad[:, :, kh:kh + H, kw:kw + W] for kh in range(3) for kw in range(3)]
    patches = jnp.stack(taps, axis=2).reshape(N, K, HW)        # (N, 9*Cin, H*W)

    w2d = weight_oihw.reshape(Cout, K)                         # (Cout, 9*Cin)
    g2d = gamma.reshape(Cout, 1)
    b2d = beta.reshape(Cout, 1)

    kernel = functools.partial(conv3x3_in_lrelu_kernel, eps=eps, slope=slope)

    out_flat = pl.pallas_call(
        kernel,
        out_shape=jax.ShapeDtypeStruct((N, Cout, HW), x_nchw.dtype),
        grid_spec=pltpu.PrefetchScalarGridSpec(
            num_scalar_prefetch=0,
            grid=(n_steps,),
            in_specs=[
                pl.BlockSpec((images_per_block, K, HW), lambda n: (n, 0, 0)),
                pl.BlockSpec((Cout, K), lambda n: (0, 0)),
                pl.BlockSpec((Cout, 1), lambda n: (0, 0)),
                pl.BlockSpec((Cout, 1), lambda n: (0, 0)),
            ],
            out_specs=pl.BlockSpec((images_per_block, Cout, HW),
                                   lambda n: (n, 0, 0)),
        ),
        compiler_params=pltpu.CompilerParams(
            dimension_semantics=("parallel",)),
    )(patches, w2d, g2d, b2d)

    # (N, Cout, H*W) -> (N, Cout, H, W): free row-major reshape, no transpose.
    return out_flat.reshape(N, Cout, H, W)


def _reference(x_nchw, weight_oihw, gamma, beta, eps=1e-5, slope=0.01):
    y = jax.lax.conv_general_dilated(
        x_nchw, weight_oihw,
        window_strides=(1, 1),
        padding=[(1, 1), (1, 1)],
        dimension_numbers=("NCHW", "OIHW", "NCHW"),
    )
    mean = jnp.mean(y, axis=(2, 3), keepdims=True)
    var = jnp.var(y, axis=(2, 3), keepdims=True)       # biased, like InstanceNorm2d
    yn = (y - mean) / jnp.sqrt(var + eps)
    ya = yn * gamma[None, :, None, None] + beta[None, :, None, None]
    return jnp.where(ya >= 0, ya, slope * ya)


if __name__ == "__main__":
    # Small shapes consistent with the module: batch=2, in_channels=4,
    # out_channels=8, spatial 16x16.
    N, Cin, Cout, H, W = 2, 4, 8, 16, 16

    key = jax.random.PRNGKey(0)
    kx, kw, kg, kb = jax.random.split(key, 4)

    x = jax.random.normal(kx, (N, Cin, H, W), dtype=jnp.float32)
    fan_in = Cin * 3 * 3
    bound = 1.0 / (fan_in ** 0.5)
    weight = jax.random.uniform(kw, (Cout, Cin, 3, 3), jnp.float32, -bound, bound)
    # InstanceNorm affine parameters (PyTorch default init is gamma=1, beta=0;
    # use non-trivial values here to exercise the affine path).
    gamma = 1.0 + 0.1 * jax.random.normal(kg, (Cout,), jnp.float32)
    beta = 0.1 * jax.random.normal(kb, (Cout,), jnp.float32)

    out = same_block_forward(x, weight, gamma, beta)
    out = jax.block_until_ready(out)

    ref = _reference(x, weight, gamma, beta)
    assert out.shape == (N, Cout, H, W), out.shape
    assert jnp.allclose(out, ref, atol=1e-4, rtol=1e-4), \
        f"max abs err = {jnp.max(jnp.abs(out - ref))}"

    print("KERNEL_OK")
</pallas_src>

<mosaic_0001>
module attributes {stable_mosaic.version = 11 : i64} {
  func.func @conv3x3_in_lrelu_kernel(%arg0: i32, %arg1: memref<1x36x256xf32, #tpu.memory_space<vmem>>, %arg2: memref<8x36xf32, #tpu.memory_space<vmem>>, %arg3: memref<8x1xf32, #tpu.memory_space<vmem>>, %arg4: memref<8x1xf32, #tpu.memory_space<vmem>>, %arg5: memref<1x8x256xf32, #tpu.memory_space<vmem>>) attributes {dimension_semantics = [#tpu.dimension_semantics<parallel>], iteration_bounds = array<i64: 2>, scalar_prefetch = 0 : i64, scratch_operands = 0 : i64, tpu.core_type = #tpu.core_type<tc>, window_params = [{transform_indices = @transform_0, window_bounds = array<i64: 1, 36, 256>}, {pipeline_mode = #tpu.pipeline_mode<synchronous>, transform_indices = @transform_1, window_bounds = array<i64: 8, 36>}, {pipeline_mode = #tpu.pipeline_mode<synchronous>, transform_indices = @transform_2, window_bounds = array<i64: 8, 1>}, {pipeline_mode = #tpu.pipeline_mode<synchronous>, transform_indices = @transform_3, window_bounds = array<i64: 8, 1>}, {transform_indices = @transform_4, window_bounds = array<i64: 1, 8, 256>}]} {
    %c0 = arith.constant 0 : index
    %c0_0 = arith.constant 0 : index
    %0 = vector.load %arg2[%c0, %c0_0] : memref<8x36xf32, #tpu.memory_space<vmem>>, vector<8x36xf32>
    %c0_1 = arith.constant 0 : index
    %c0_2 = arith.constant 0 : index
    %1 = vector.load %arg3[%c0_1, %c0_2] : memref<8x1xf32, #tpu.memory_space<vmem>>, vector<8x1xf32>
    %c0_3 = arith.constant 0 : index
    %c0_4 = arith.constant 0 : index
    %2 = vector.load %arg4[%c0_3, %c0_4] : memref<8x1xf32, #tpu.memory_space<vmem>>, vector<8x1xf32>
    %c0_5 = arith.constant 0 : index
    %c0_6 = arith.constant 0 : index
    %c0_7 = arith.constant 0 : index
    %3 = vector.load %arg1[%c0_5, %c0_6, %c0_7] : memref<1x36x256xf32, #tpu.memory_space<vmem>>, vector<1x36x256xf32>
    %4 = vector.shape_cast %3 : vector<1x36x256xf32> to vector<36x256xf32>
    %cst = arith.constant dense<0.000000e+00> : vector<8x256xf32>
    %5 = tpu.matmul %0, %4, %cst {dimension_numbers = #tpu.dot_dimension_numbers<[1], [0], [0], [1], [0, 0, 1, 1], [], []>} : vector<8x36xf32>, vector<36x256xf32>, vector<8x256xf32> -> vector<8x256xf32>
    %cst_8 = arith.constant dense<0.000000e+00> : vector<8xf32>
    %6 = vector.multi_reduction <add>, %5, %cst_8 [1] : vector<8x256xf32> to vector<8xf32>
    %7 = vector.shape_cast %6 : vector<8xf32> to vector<8x1xf32>
    %cst_9 = arith.constant 2.560000e+02 : f32
    %8 = vector.broadcast %cst_9 : f32 to vector<8x1xf32>
    %9 = arith.divf %7, %8 : vector<8x1xf32>
    %10 = vector.broadcast %9 : vector<8x1xf32> to vector<8x256xf32>
    %11 = arith.subf %5, %10 : vector<8x256xf32>
    %12 = arith.mulf %11, %11 : vector<8x256xf32>
    %cst_10 = arith.constant dense<0.000000e+00> : vector<8xf32>
    %13 = vector.multi_reduction <add>, %12, %cst_10 [1] : vector<8x256xf32> to vector<8xf32>
    %14 = vector.shape_cast %13 : vector<8xf32> to vector<8x1xf32>
    %cst_11 = arith.constant 2.560000e+02 : f32
    %15 = vector.broadcast %cst_11 : f32 to vector<8x1xf32>
    %16 = arith.divf %14, %15 : vector<8x1xf32>
    %cst_12 = arith.constant 9.99999974E-6 : f32
    %17 = vector.broadcast %cst_12 : f32 to vector<8x1xf32>
    %18 = arith.addf %16, %17 : vector<8x1xf32>
    %19 = math.rsqrt %18 : vector<8x1xf32>
    %20 = arith.mulf %1, %19 : vector<8x1xf32>
    %21 = vector.broadcast %20 : vector<8x1xf32> to vector<8x256xf32>
    %22 = arith.mulf %11, %21 : vector<8x256xf32>
    %23 = vector.broadcast %2 : vector<8x1xf32> to vector<8x256xf32>
    %24 = arith.addf %22, %23 : vector<8x256xf32>
    %cst_13 = arith.constant 0.000000e+00 : f32
    %25 = vector.broadcast %cst_13 : f32 to vector<8x256xf32>
    %26 = arith.cmpf oge, %24, %25 : vector<8x256xf32>
    %cst_14 = arith.constant 0.00999999977 : f32
    %27 = vector.broadcast %cst_14 : f32 to vector<8x256xf32>
    %28 = arith.mulf %27, %24 : vector<8x256xf32>
    %29 = arith.select %26, %24, %28 : vector<8x256xi1>, vector<8x256xf32>
    %c0_15 = arith.constant 0 : index
    %c0_16 = arith.constant 0 : index
    %c0_17 = arith.constant 0 : index
    %30 = vector.load %arg5[%c0_15, %c0_16, %c0_17] : memref<1x8x256xf32, #tpu.memory_space<vmem>>, vector<1x8x256xf32>
    %31 = vector.shape_cast %30 : vector<1x8x256xf32> to vector<8x256xf32>
    %32 = vector.shape_cast %29 : vector<8x256xf32> to vector<1x8x256xf32>
    tpu.vector_store %arg5[%c0_15, %c0_16, %c0_17], %32 {strides = array<i32>} : memref<1x8x256xf32, #tpu.memory_space<vmem>>, vector<1x8x256xf32>,
    return
  }
  func.func @transform_0(%arg0: i32) -> (i32, i32, i32) {
    %c0_i32 = arith.constant 0 : i32
    %c0_i32_0 = arith.constant 0 : i32
    %c0_i32_1 = arith.constant 0 : i32
    return %arg0, %c0_i32, %c0_i32_0 : i32, i32, i32
  }
  func.func @transform_1(%arg0: i32) -> (i32, i32) {
    %c0_i32 = arith.constant 0 : i32
    %c0_i32_0 = arith.constant 0 : i32
    %c0_i32_1 = arith.constant 0 : i32
    return %c0_i32, %c0_i32_0 : i32, i32
  }
  func.func @transform_2(%arg0: i32) -> (i32, i32) {
    %c0_i32 = arith.constant 0 : i32
    %c0_i32_0 = arith.constant 0 : i32
    %c0_i32_1 = arith.constant 0 : i32
    return %c0_i32, %c0_i32_0 : i32, i32
  }
  func.func @transform_3(%arg0: i32) -> (i32, i32) {
    %c0_i32 = arith.constant 0 : i32
    %c0_i32_0 = arith.constant 0 : i32
    %c0_i32_1 = arith.constant 0 : i32
    return %c0_i32, %c0_i32_0 : i32, i32
  }
  func.func @transform_4(%arg0: i32) -> (i32, i32, i32) {
    %c0_i32 = arith.constant 0 : i32
    %c0_i32_0 = arith.constant 0 : i32
    %c0_i32_1 = arith.constant 0 : i32
    return %arg0, %c0_i32, %c0_i32_0 : i32, i32, i32
  }
}

</mosaic_0001>

<bundles_post_ra>
// kernel: tpu_custom_call.1
= control target key start
LH: loop header
LB: loop body
LE: loop exit
PB: predicated region body
PF: predicated region fallthrough
CT: control target
= control target key end

     0   :  { %9 = vsyncpa [#allocation3], 0  ;;  %s673_s0 = inlined_call_operand.vmem [shape: f32[2,36,256], index: 0, kind: input, shape index: {}]   ;;  %s674_s1 = inlined_call_operand.vmem [shape: f32[8,36], index: 1, kind: input, shape index: {}]   ;;  %s675_s2 = inlined_call_operand.vmem [shape: f32[8,1], index: 2, kind: input, shape index: {}]   ;;  %s676_s3 = inlined_call_operand.vmem [shape: f32[8,1], index: 3, kind: input, shape index: {}]   ;;  %s677_s4 = inlined_call_operand.hbm [shape: f32[2,8,256], index: 4, kind: output, shape index: {}]  }
   0x1   :  { %11 = vsyncpa [#allocation3 + $0x1], 0  ;;  %s564_s15 = smov 0   ;;  %s566_s16 = smov 0  }
   0x2   :  { %s568_s17 = smov 0   ;;  %s570_s18 = smov 0  }
   0x3 LB: > { %s585_s19 = sadd.s32 4294967295, %s534_s18   ;;  %s403_s20 = sadd.s32 4294967294, %s534_s18   ;;  %s534_s18 = sphi %s570_s18, %s683_s18   ;;  %s530_s17 = sphi %s568_s17, %s682_s17   ;;  %s526_s16 = sphi %s566_s16, %s681_s16   ;;  %s522_s15 = sphi %s564_s15, %s680_s15  }
   0x4   : > { %s589_s21 = sadd.s32 1, %s534_s18   ;;  %s113_s22 = sadd.s32 1, %s530_s17 }
   0x5   : > { %s110_s23 = ssub.s32 %s534_s18, %s589_s21  ;;  %p123_p0 = scmp.ne.s32.totalorder %s530_s17, %s526_s16 }
   0x6   : > { %p111_p1 = scmp.eq.s32.totalorder %s110_s23, 0  ;;  %p124_p2 = scmp.eq.s32.totalorder %s585_s19, 1 }
   0x7   : > { %p129_p3 = scmp.ne.s32.totalorder %s526_s16, %s522_s15  ;;  %p130_p4 = scmp.eq.s32.totalorder %s403_s20, 1 }
   0x8   : > { %s600_s24 = scalar_select %p111_p1, %s530_s17, %s113_s22  }
   0x9   : > { %p602_p5 = por %p124_p2, %p123_p0  ;;  %p606_p6 = por %p130_p4, %p129_p3 }
   0xa   : > { %p406_p7 = scmp.ge.s32.totalorder %s534_s18, 1  ;;  %p165_p8 = scmp.lt.s32.totalorder %s534_s18, 3 }
   0xc   : > { %p166_p9 = pnand %p406_p7, %p165_p8 }
   0xd   : > { %p191_p10 = scmp.lt.s32.totalorder (!%p166_p9), %s585_s19, 1  ;;  %v536_v0 = vmov (!%p166_p9), 0.0   ;;  %vm213_vm0 = vcmask (!%p166_p9), 1043456   ;;  %v196_v15 = vld [vmem:[%s674_s1] sm:$0xff] (!%p166_p9)  ;;  %vm209_vm1 = vcmask (!%p166_p9), 293888   ;;  %v537_v26 = vmov (!%p166_p9), 0  }
   0xe   : > { %169 = sbr.rel (%p166_p9) target bundleno = 714 (0x2ca), region = 36  ;;  %284 = vmatprep.mubr.f32.mxu0 (!%p166_p9), %v536_v0  ;;  %468 = vset.pattern.permute.xlu1 (!%p166_p9), %v537_v26  ;;  %v197_v30 = vld [vmem:[%s675_s2] sm:$0xff] (!%p166_p9)  ;;  %s188_s12 = sand.u32 (!%p166_p9), 1, %s526_s16  }
   0xf   : > { %469 = vset.pattern.permute.xlu0 (!%p166_p9), %v537_v26  ;;  %v198_v33 = vld [vmem:[%s676_s3] sm:$0xff] (!%p166_p9)  ;;  %s407_s13 = sshll.u32 (!%p166_p9), %s188_s12, 4  ;;  %s417_s14 = sshll.u32 (!%p166_p9), %s585_s19, 8 }
  0x10   : > { %s190_s20 = scalar_lea.vmem (!%p166_p9), [#allocation2], %s407_s13  ;;  %s538_s30 = smov (!%p166_p9), [#allocation2]  }
  0x11   : > { %s344_s22 = sshll.u32 (!%p166_p9), %s190_s20, 4  ;;  %s633_s22 = int_to_ptr.vmem [resolvable:$true] %s344_s22 }
  0x12   : > { %s472_s29 = scalar_lea.vmem (!%p166_p9), %s633_s22, 256 }
  0x13   : > { %p473_p11 = scmp.ne.s32.totalorder (!%p166_p9), %s633_s22, %s472_s29 }
  0x15   : > { %s192_s27 = scalar_select %p191_p10, %s585_s19, 1 }
  0x16   : > { %s330_s19 = scalar_lea.sflag [#allocation3], %s188_s12  ;;  %p474_p12 = pnand %p473_p11, %p602_p5 }
  0x17   : > { %s426_s28 = smul.u32 80, %s192_s27 }
  0x18   : > { %p475_p13 = pneg %p474_p12 }
  0x19   : > { %s195_s5 = scalar_lea.vmem %s673_s0, %s426_s28  ;;  %s631_s28 = scalar_lea.hbm %s677_s4, %s417_s14 }
  0x1a   : > { %v200_v1 = vld [vmem:[%s195_s5 + $0x8] sm:$0xff]  ;;  %v202_v2 = vld [vmem:[%s195_s5 + $0x18] sm:$0xff]  ;;  %v199_v3 = vld [vmem:[%s195_s5] sm:$0xff] }
  0x1b   : > { %v418_v4 = vpack.c.bf16 %v202_v2, %v200_v1  ;;  %v201_v5 = vld [vmem:[%s195_s5 + $0x10] sm:$0xff]  ;;  %v204_v6 = vld [vmem:[%s195_s5 + $0x28] sm:$0xff]  ;;  %v206_v7 = vld [vmem:[%s195_s5 + $0x38] sm:$0xff] }
  0x1c   : > { %v420_v8 = vpack.c.bf16 %v201_v5, %v199_v3  ;;  %v422_v9 = vpack.c.bf16 %v206_v7, %v204_v6  ;;  %v203_v10 = vld [vmem:[%s195_s5 + $0x20] sm:$0xff]  ;;  %v205_v11 = vld [vmem:[%s195_s5 + $0x30] sm:$0xff]  ;;  %v208_v13 = vld [vmem:[%s195_s5 + $0x48] sm:$0xf] }
  0x1d   : > { %419 = vmatprep.subr.bf16.mxu0 %v418_v4  ;;  %v424_v12 = vpack.c.bf16 %v205_v11, %v203_v10  ;;  %v207_v14 = vld [vmem:[%s195_s5 + $0x40] sm:$0xf]  ;;  %s476_s5 = sshll.u32 %s538_s30, 4  ;;  %s477_s5 = int_to_ptr.vmem [resolvable:$false] %s476_s5 }
  0x1e   : > { %421 = vmatpush1.bf16.msra.mxu0 %v420_v8  ;;  %s478_s6 = scalar_lea.vmem %s477_s5, 512  ;;  %p479_p0 = scmp.lt.s32.totalorder %s633_s22, %s477_s5 }
  0x1f   : > { %423 = vmatprep.subr.bf16.mxu0 %v422_v9  ;;  %p480_p1 = scmp.lt.s32.totalorder %s478_s6, %s472_s29 }
  0x21   : > { %p481_p2 = por %p480_p1, %p479_p0 }
  0x22   : > { %425 = vmatpush1.bf16.msra.mxu0 %v424_v12 }
  0x23   : > { %409 = vmatprep.subr.msk.mxu0 %vm213_vm0, %v208_v13  ;;  %p482_p3 = pnand %p481_p2, %p475_p13 }
  0x26   : > { %410 = vmatpush1.msk.msra.mxu0 %vm213_vm0, %v207_v14 }
  0x27   : > { %411 = vmatmul.mubr.msk.f32.vlgmr.msra.gmra.mrb[0].mxu0 %vm209_vm1, %v196_v15 }
  0xfa   : > { %v286_v16 = vpop.f32.mrb[0].mxu0 }
  0xfb   : > { %v288_v17 = vpop.f32.mrb[1].mxu0 }
  0xfc   : > { %v291_v18 = vadd.f32 %v288_v17, %v286_v16 }
  0xfe   : > { %292 = vadd.xlane.f32.xlu0 %v291_v18 }
 0x18b   : > { %v293_v19 = vpop.xlane.xlu0 %292 }
 0x18c   : > { %v295_v20 = vmul.f32 0.00390625, %v293_v19 }
 0x18e   : > { %v296_v21 = vsub.f32 %v286_v16, %v295_v20  ;;  %v297_v22 = vsub.f32 %v288_v17, %v295_v20 }
 0x190   : > { %v298_v23 = vmul.f32 %v296_v21, %v296_v21  ;;  %v299_v24 = vmul.f32 %v297_v22, %v297_v22 }
 0x192   : > { %v300_v25 = vadd.f32 %v299_v24, %v298_v23 }
 0x194   : > { %301 = vadd.xlane.f32.xlu0 %v300_v25 }
 0x221   : > { %v302_v27 = vpop.xlane.xlu0 %301 }
 0x222   : > { %v303_v28 = vmul.f32 0.00390625, %v302_v27 }
 0x224   : > { %v304_v29 = vadd.f32 1e-05, %v303_v28 }
 0x226   : > { %470 = vrsqrt.f32 %v304_v29 }
 0x230   : > { %v471_v31 = vpop.eup %470 }
 0x231   : > { %v306_v32 = vmul.f32 %v471_v31, %v197_v30 }
 0x233   : > { %309 = vperm.xlu1 %468, %v306_v32  }
 0x237   : > { %316 = vperm.xlu1 %468, %v198_v33  }
 0x2b2   : > { %v310_v34 = vpop.permute.xlu1 %309 }
 0x2b3   : > { %v312_v35 = vmul.f32 %v310_v34, %v296_v21  ;;  %v313_v36 = vmul.f32 %v310_v34, %v297_v22 }
 0x2b6   : > { %v317_v37 = vpop.permute.xlu1 %316 }
 0x2b7   : > { %v319_v38 = vadd.f32 %v317_v37, %v312_v35  ;;  %v320_v39 = vadd.f32 %v317_v37, %v313_v36 }
 0x2b9   : > { %vm321_vm2 = vcmp.ge.f32.partialorder %v319_v38, 0.0  ;;  %vm322_vm3 = vcmp.ge.f32.partialorder %v320_v39, 0.0  ;;  %v323_v40 = vmul.f32 0.01, %v319_v38  ;;  %v324_v41 = vmul.f32 0.01, %v320_v39 }
 0x2bb   : > { %v325_v42 = vsel %vm321_vm2, %v319_v38, %v323_v40  ;;  %v326_v43 = vsel %vm322_vm3, %v320_v39, %v324_v41 }
 0x2bc   : > { %327 = vst [vmem:[%s190_s20] sm:$0xff] %v325_v42  ;;  %328 = vst [vmem:[%s190_s20 + $0x8] sm:$0xff] %v326_v43 }
 0x2bd   : > { %485 = shalt.err (!%p482_p3)
}
 0x2be   : > { %s486_s7 = scalar_lea.hbm %s631_s28, 256  ;;  %s490_s10 = scalar_lea.hbm %s677_s4, 512 }
 0x2bf   : > { %p487_p4 = scmp.ne.s32.totalorder %s631_s28, %s486_s7  ;;  %p491_p9 = scmp.lt.u32.totalorder %s631_s28, %s677_s4 }
 0x2c0   : > { %p492_p10 = scmp.lt.u32.totalorder %s490_s10, %s486_s7  ;;  %p494_p12 = scmp.lt.u32.totalorder %s486_s7, %s631_s28 }
 0x2c1   : > { %p488_p7 = pnand %p487_p4, %p602_p5 }
 0x2c2   : > { %p493_p11 = por %p492_p10, %p491_p9 }
 0x2c3   : > { %p489_p8 = pneg %p488_p7 }
 0x2c4   : > { %p495_p13 = por %p494_p12, %p493_p11 }
 0x2c6   : > { %p496_p0 = pnand %p495_p13, %p489_p8 }
 0x2c8   : > { %499 = shalt.err (!%p496_p0)
}
 0x2c9   : > { %427 = dma.vmem_to_hbm [thread:$0]  (%p602_p5), %s633_s22, 256, %s631_s28, %s330_s19  }
 0x2ca PF: > { %p433_p1 = scmp.ge.s32.totalorder %s534_s18, 2  ;;  %s356_s13 = sand.u32 1, %s522_s15  }
 0x2cb   : > { %s357_s14 = scalar_lea.sflag [#allocation3], %s356_s13 }
 0x2cc   : > { %p430_p2 = pnand %p433_p1, %p606_p6 }
 0x2ce   : > { %517 = dma.done.wait (!%p430_p2), %s357_s14, 256  }
 0x2cf   : > { %519 = vsyncadd (!%p430_p2), %s357_s14, 4294967040  ;;  %p14_p3 = scmp.ge.s32.totalorder %s589_s21, 4   ;;  %s680_s15 = smov %s526_s16 }
 0x2d0   : > { %s681_s16 = smov %s530_s17  ;;  %s682_s17 = smov %s600_s24 }
 0x2d1   : > { %s683_s18 = smov %s589_s21  ;;  %16 = sbr.rel (!%p14_p3) target bundleno = 3 (0x3), region = 71 }
 0x2d8   :  { %362 = vsyncpa [#allocation3], 1 }
 0x2d9   :  { %364 = vsyncpa [#allocation3 + $0x1], 1 }

</bundles_post_ra>
